<compile_context>
chip_gen: v7x
topology: tpu7x:2x2x1
jax: 0.10.0
libtpu: 0.0.40
codegen_flags: <defaults>
</compile_context>

<pallas_src>
import math

import jax
import jax.numpy as jnp
from jax.experimental import pallas as pl
from jax.experimental.pallas import tpu as pltpu


def _round_up(a, b):
    return ((a + b - 1) // b) * b


def _num_tensorcores_per_chip():
    """Best-effort: v7x exposes 2 TensorCores per chip; earlier gens 1."""
    try:
        kind = jax.devices()[0].device_kind.lower()
    except Exception:
        return 1
    return 2 if "7" in kind else 1


def _make_transition_kernel(rc_p, nchunks, unroll):
    """Fused LayerNorm+MLP kernel over a (tp, Dp) lane-packed row block."""

    def kernel(x_ref, avg_ref, gamma_ref, beta_ref, w1_ref, b1_ref, w2_ref,
               b2_ref, o_ref):
        # Resident params: loaded into vregs once per grid step (hoisted out of
        # the chunk loop -- JAX does not CSE broadcasts inside loops).
        avg = avg_ref[...]        # (Dp, Dp) f32 block-diagonal averaging matrix
        gamma = gamma_ref[...]    # (1, Dp) f32
        beta = beta_ref[...]      # (1, Dp) f32
        b1 = b1_ref[...]          # (1, Hp) f32
        b2 = b2_ref[...]          # (1, Dp) f32
        w1 = w1_ref[...]          # (Dp, Hp) matmul dtype (bf16 by default)
        w2 = w2_ref[...]          # (Hp, Dp) matmul dtype

        def chunk(c, carry):
            r0 = pl.multiple_of(c * rc_p, rc_p)
            xf = x_ref[pl.ds(r0, rc_p), :].astype(jnp.float32)

            # LayerNorm stats per 32-lane group via block-diagonal matmuls
            # (MXU), independent reductions, biased variance, eps=1e-5.
            mean = jnp.dot(xf, avg, preferred_element_type=jnp.float32)
            ex2 = jnp.dot(xf * xf, avg, preferred_element_type=jnp.float32)
            var = jnp.maximum(ex2 - mean * mean, 0.0)
            xn = (xf - mean) * jax.lax.rsqrt(var + 1e-5) * gamma + beta

            # Linear(dim -> dim*n) + ReLU, f32 accumulation on the MXU.
            h = jnp.dot(xn.astype(w1.dtype), w1,
                        preferred_element_type=jnp.float32) + b1
            h = jnp.maximum(h, 0.0)

            # Linear(dim*n -> dim).
            out = jnp.dot(h.astype(w2.dtype), w2,
                          preferred_element_type=jnp.float32) + b2
            o_ref[pl.ds(r0, rc_p), :] = out.astype(o_ref.dtype)
            return carry

        jax.lax.fori_loop(0, nchunks, chunk, 0, unroll=unroll)

    return kernel


def transition_forward(x, gamma, beta, w1_t, b1, w2_t, b2, *, tm=4096, rc=256,
                       unroll=2, bf16_matmul=True):
    """Fused LayerNorm -> Linear -> ReLU -> Linear.

    x: (..., D).  Weights are pre-transposed to (in, out): w1_t (D, H), w2_t (H, D).
    tm: logical rows per grid step (DMA slab).  rc: logical rows per compute chunk.
    bf16_matmul: cast matmul operands to bf16 (f32 accumulation) for full MXU rate.
    """
    lead = x.shape[:-1]
    D = x.shape[-1]
    H = w1_t.shape[1]
    M = math.prod(lead)

    # Lane-pack factor: p logical rows per 128-lane row (pure contiguous reshape).
    p = (128 // D) if (D <= 128 and 128 % D == 0) else 1
    Dp, Hp = D * p, H * p

    mm_dtype = jnp.bfloat16 if (bf16_matmul or x.dtype == jnp.bfloat16) else jnp.float32

    # --- tile selection (packed rows) ----------------------------------------
    ncores = _num_tensorcores_per_chip()
    min_steps = 8 if ncores >= 2 else 2          # 2-TC v7x wants shardable grid
    P_raw = pl.cdiv(M, p)                        # packed rows needed
    tp_req = max(8, tm // p)                     # requested packed rows / step
    rc_p = max(8, (max(1, rc // p) // 8) * 8)    # packed rows per compute chunk

    tp_eff = min(tp_req, max(8, pl.cdiv(P_raw, min_steps)))
    if tp_eff >= rc_p:
        tp_eff = _round_up(tp_eff, rc_p)
        rc_eff = rc_p
    else:
        tp_eff = _round_up(tp_eff, 8)
        rc_eff = tp_eff
    grid_m = pl.cdiv(P_raw, tp_eff)
    P_pad = grid_m * tp_eff
    m_pad = P_pad * p
    nchunks = tp_eff // rc_eff
    unroll_eff = max(1, min(unroll, nchunks))

    # --- pack rows: (M, D) -> (P_pad, Dp), zero-padding the remainder ---------
    x2d = x.reshape(M, D)
    if m_pad != M:
        x2d = jnp.pad(x2d, ((0, m_pad - M), (0, 0)))
    x_packed = x2d.reshape(P_pad, Dp)

    # --- block-diagonalized weights & lane-tiled params -----------------------
    eye_p = jnp.eye(p, dtype=jnp.float32)
    w1_blk = jnp.kron(eye_p, w1_t.astype(jnp.float32)).astype(mm_dtype)   # (Dp, Hp)
    w2_blk = jnp.kron(eye_p, w2_t.astype(jnp.float32)).astype(mm_dtype)   # (Hp, Dp)
    avg = jnp.kron(eye_p, jnp.full((D, D), 1.0 / D, jnp.float32))         # (Dp, Dp)
    gamma2 = jnp.tile(gamma.astype(jnp.float32), p).reshape(1, Dp)
    beta2 = jnp.tile(beta.astype(jnp.float32), p).reshape(1, Dp)
    b1_2 = jnp.tile(b1.astype(jnp.float32), p).reshape(1, Hp)
    b2_2 = jnp.tile(b2.astype(jnp.float32), p).reshape(1, Dp)

    kernel = _make_transition_kernel(rc_eff, nchunks, unroll_eff)

    out_packed = pl.pallas_call(
        kernel,
        out_shape=jax.ShapeDtypeStruct((P_pad, Dp), x.dtype),
        grid_spec=pltpu.PrefetchScalarGridSpec(
            num_scalar_prefetch=0,
            grid=(grid_m,),
            in_specs=[
                pl.BlockSpec((tp_eff, Dp), lambda i: (i, 0)),   # packed rows slab
                pl.BlockSpec((Dp, Dp), lambda i: (0, 0)),       # averaging matrix
                pl.BlockSpec((1, Dp), lambda i: (0, 0)),        # gamma (resident)
                pl.BlockSpec((1, Dp), lambda i: (0, 0)),        # beta
                pl.BlockSpec((Dp, Hp), lambda i: (0, 0)),       # W1 block-diag
                pl.BlockSpec((1, Hp), lambda i: (0, 0)),        # b1
                pl.BlockSpec((Hp, Dp), lambda i: (0, 0)),       # W2 block-diag
                pl.BlockSpec((1, Dp), lambda i: (0, 0)),        # b2
            ],
            out_specs=pl.BlockSpec((tp_eff, Dp), lambda i: (i, 0)),
        ),
        compiler_params=pltpu.CompilerParams(
            dimension_semantics=("parallel",)),
    )(x_packed, avg, gamma2, beta2, w1_blk, b1_2, w2_blk, b2_2)

    out2d = out_packed.reshape(m_pad, D)
    if m_pad != M:
        out2d = out2d[:M]
    return out2d.reshape(lead + (D,))


def reference_forward(x, gamma, beta, w1_t, b1, w2_t, b2):
    xf = x.astype(jnp.float32)
    mean = jnp.mean(xf, axis=-1, keepdims=True)
    var = jnp.mean((xf - mean) ** 2, axis=-1, keepdims=True)
    xn = (xf - mean) * jax.lax.rsqrt(var + 1e-5) * gamma.astype(jnp.float32) \
        + beta.astype(jnp.float32)
    h = jnp.maximum(xn @ w1_t.astype(jnp.float32) + b1.astype(jnp.float32), 0.0)
    return h @ w2_t.astype(jnp.float32) + b2.astype(jnp.float32)


if __name__ == "__main__":
    B, S, D, N = 2, 8, 32, 2   # node_dim=32, hidden = dim*n = 64
    H = D * N

    key = jax.random.PRNGKey(0)
    kx, kw1, kb1, kw2, kb2, kx2, kxe = jax.random.split(key, 7)

    x = jax.random.normal(kx, (B, S, D), dtype=jnp.float32)

    # Deterministic parameter init (synthetic, nn.Linear-style U(+-1/sqrt(fan_in)),
    # stored transposed as (in, out)).
    gamma = jnp.ones((D,), dtype=jnp.float32)
    beta = jnp.zeros((D,), dtype=jnp.float32)
    w1_t = jax.random.uniform(kw1, (D, H), minval=-1.0, maxval=1.0) / jnp.sqrt(D)
    b1 = jax.random.uniform(kb1, (H,), minval=-1.0, maxval=1.0) / jnp.sqrt(D)
    w2_t = jax.random.uniform(kw2, (H, D), minval=-1.0, maxval=1.0) / jnp.sqrt(H)
    b2 = jax.random.uniform(kb2, (D,), minval=-1.0, maxval=1.0) / jnp.sqrt(H)

    # --- small node-shaped input (original spec sizes) -------------------------
    out = jax.block_until_ready(transition_forward(x, gamma, beta, w1_t, b1, w2_t, b2))
    ref = reference_forward(x, gamma, beta, w1_t, b1, w2_t, b2)
    assert out.shape == (B, S, D)
    assert float(jnp.max(jnp.abs(out.astype(jnp.float32) - ref))) < 3e-2, "small-shape mismatch"

    # --- f32-matmul (opt-out) path ---------------------------------------------
    out_f32 = jax.block_until_ready(
        transition_forward(x, gamma, beta, w1_t, b1, w2_t, b2, bf16_matmul=False))
    assert float(jnp.max(jnp.abs(out_f32.astype(jnp.float32) - ref))) < 3e-2, "f32-matmul mismatch"

    # --- larger shape: multiple grid steps, tile cap, remainder padding --------
    B2, S2 = 3, 403                      # M = 1209, not a multiple of any tile
    x2 = jax.random.normal(kx2, (B2, S2, D), dtype=jnp.float32)
    out2 = jax.block_until_ready(transition_forward(x2, gamma, beta, w1_t, b1, w2_t, b2))
    ref2 = reference_forward(x2, gamma, beta, w1_t, b1, w2_t, b2)
    assert out2.shape == (B2, S2, D)
    assert float(jnp.max(jnp.abs(out2.astype(jnp.float32) - ref2))) < 3e-2, "large-shape mismatch"

    # --- edge-shaped (4-D) input as used by EdgeUpdate.transition --------------
    xe = jax.random.normal(kxe, (2, 12, 12, D), dtype=jnp.float32)
    out_e = jax.block_until_ready(transition_forward(xe, gamma, beta, w1_t, b1, w2_t, b2))
    ref_e = reference_forward(xe, gamma, beta, w1_t, b1, w2_t, b2)
    assert out_e.shape == xe.shape
    assert float(jnp.max(jnp.abs(out_e.astype(jnp.float32) - ref_e))) < 3e-2, "edge-shape mismatch"

    # --- bf16 activation/weight path (f32 LN math + f32 MXU accumulation) ------
    to_bf16 = lambda a: a.astype(jnp.bfloat16)
    out_bf = jax.block_until_ready(transition_forward(
        to_bf16(x2), to_bf16(gamma), to_bf16(beta),
        to_bf16(w1_t), to_bf16(b1), to_bf16(w2_t), to_bf16(b2)))
    assert out_bf.dtype == jnp.bfloat16
    obf = out_bf.astype(jnp.float32)
    assert bool(jnp.all(jnp.isfinite(obf))), "bf16 path produced non-finite values"
    assert float(jnp.max(jnp.abs(obf - ref2))) < 0.25, "bf16 path diverged from f32 reference"

    print("KERNEL_OK")
</pallas_src>

<mosaic_0001>
module attributes {stable_mosaic.version = 11 : i64} {
  func.func @kernel(%arg0: i32, %arg1: memref<8x128xf32, #tpu.memory_space<vmem>>, %arg2: memref<128x128xf32, #tpu.memory_space<vmem>>, %arg3: memref<1x128xf32, #tpu.memory_space<vmem>>, %arg4: memref<1x128xf32, #tpu.memory_space<vmem>>, %arg5: memref<128x256xbf16, #tpu.memory_space<vmem>>, %arg6: memref<1x256xf32, #tpu.memory_space<vmem>>, %arg7: memref<256x128xbf16, #tpu.memory_space<vmem>>, %arg8: memref<1x128xf32, #tpu.memory_space<vmem>>, %arg9: memref<8x128xf32, #tpu.memory_space<vmem>>) attributes {dimension_semantics = [#tpu.dimension_semantics<parallel>], iteration_bounds = array<i64: 1>, scalar_prefetch = 0 : i64, scratch_operands = 0 : i64, tpu.core_type = #tpu.core_type<tc>, window_params = [{transform_indices = @transform_0, window_bounds = array<i64: 8, 128>}, {pipeline_mode = #tpu.pipeline_mode<synchronous>, transform_indices = @transform_1, window_bounds = array<i64: 128, 128>}, {pipeline_mode = #tpu.pipeline_mode<synchronous>, transform_indices = @transform_2, window_bounds = array<i64: 1, 128>}, {pipeline_mode = #tpu.pipeline_mode<synchronous>, transform_indices = @transform_3, window_bounds = array<i64: 1, 128>}, {pipeline_mode = #tpu.pipeline_mode<synchronous>, transform_indices = @transform_4, window_bounds = array<i64: 128, 256>}, {pipeline_mode = #tpu.pipeline_mode<synchronous>, transform_indices = @transform_5, window_bounds = array<i64: 1, 256>}, {pipeline_mode = #tpu.pipeline_mode<synchronous>, transform_indices = @transform_6, window_bounds = array<i64: 256, 128>}, {pipeline_mode = #tpu.pipeline_mode<synchronous>, transform_indices = @transform_7, window_bounds = array<i64: 1, 128>}, {transform_indices = @transform_8, window_bounds = array<i64: 8, 128>}]} {
    %c0 = arith.constant 0 : index
    %c0_0 = arith.constant 0 : index
    %0 = vector.load %arg2[%c0, %c0_0] : memref<128x128xf32, #tpu.memory_space<vmem>>, vector<128x128xf32>
    %c0_1 = arith.constant 0 : index
    %c0_2 = arith.constant 0 : index
    %1 = vector.load %arg3[%c0_1, %c0_2] : memref<1x128xf32, #tpu.memory_space<vmem>>, vector<1x128xf32>
    %c0_3 = arith.constant 0 : index
    %c0_4 = arith.constant 0 : index
    %2 = vector.load %arg4[%c0_3, %c0_4] : memref<1x128xf32, #tpu.memory_space<vmem>>, vector<1x128xf32>
    %c0_5 = arith.constant 0 : index
    %c0_6 = arith.constant 0 : index
    %3 = vector.load %arg6[%c0_5, %c0_6] : memref<1x256xf32, #tpu.memory_space<vmem>>, vector<1x256xf32>
    %c0_7 = arith.constant 0 : index
    %c0_8 = arith.constant 0 : index
    %4 = vector.load %arg8[%c0_7, %c0_8] : memref<1x128xf32, #tpu.memory_space<vmem>>, vector<1x128xf32>
    %c0_9 = arith.constant 0 : index
    %c0_10 = arith.constant 0 : index
    %5 = vector.load %arg5[%c0_9, %c0_10] : memref<128x256xbf16, #tpu.memory_space<vmem>>, vector<128x256xbf16>
    %c0_11 = arith.constant 0 : index
    %c0_12 = arith.constant 0 : index
    %6 = vector.load %arg7[%c0_11, %c0_12] : memref<256x128xbf16, #tpu.memory_space<vmem>>, vector<256x128xbf16>
    %c0_i32 = arith.constant 0 : i32
    %c8_i32 = arith.constant 8 : i32
    %7 = arith.muli %c0_i32, %c8_i32 : i32
    %8 = tpu.assume_multiple %7, 8 : i32
    %9 = arith.index_cast %8 : i32 to index
    %c0_13 = arith.constant 0 : index
    %10 = vector.load %arg1[%9, %c0_13] : memref<8x128xf32, #tpu.memory_space<vmem>>, vector<8x128xf32>
    %cst = arith.constant dense<0.000000e+00> : vector<8x128xf32>
    %11 = tpu.matmul %10, %0, %cst {dimension_numbers = #tpu.dot_dimension_numbers<[1], [0], [0], [1], [0, 0, 1, 1], [], []>} : vector<8x128xf32>, vector<128x128xf32>, vector<8x128xf32> -> vector<8x128xf32>
    %12 = arith.mulf %10, %10 : vector<8x128xf32>
    %cst_14 = arith.constant dense<0.000000e+00> : vector<8x128xf32>
    %13 = tpu.matmul %12, %0, %cst_14 {dimension_numbers = #tpu.dot_dimension_numbers<[1], [0], [0], [1], [0, 0, 1, 1], [], []>} : vector<8x128xf32>, vector<128x128xf32>, vector<8x128xf32> -> vector<8x128xf32>
    %14 = arith.mulf %11, %11 : vector<8x128xf32>
    %15 = arith.subf %13, %14 : vector<8x128xf32>
    %cst_15 = arith.constant 0.000000e+00 : f32
    %16 = vector.broadcast %cst_15 : f32 to vector<8x128xf32>
    %17 = arith.maximumf %15, %16 : vector<8x128xf32>
    %18 = arith.subf %10, %11 : vector<8x128xf32>
    %cst_16 = arith.constant 9.99999974E-6 : f32
    %19 = vector.broadcast %cst_16 : f32 to vector<8x128xf32>
    %20 = arith.addf %17, %19 : vector<8x128xf32>
    %21 = math.rsqrt %20 : vector<8x128xf32>
    %22 = arith.mulf %18, %21 : vector<8x128xf32>
    %23 = vector.broadcast %1 : vector<1x128xf32> to vector<8x128xf32>
    %24 = arith.mulf %22, %23 : vector<8x128xf32>
    %25 = vector.broadcast %2 : vector<1x128xf32> to vector<8x128xf32>
    %26 = arith.addf %24, %25 : vector<8x128xf32>
    %27 = arith.truncf %26 : vector<8x128xf32> to vector<8x128xbf16>
    %cst_17 = arith.constant dense<0.000000e+00> : vector<8x256xf32>
    %28 = tpu.matmul %27, %5, %cst_17 {dimension_numbers = #tpu.dot_dimension_numbers<[1], [0], [0], [1], [0, 0, 1, 1], [], []>} : vector<8x128xbf16>, vector<128x256xbf16>, vector<8x256xf32> -> vector<8x256xf32>
    %29 = vector.broadcast %3 : vector<1x256xf32> to vector<8x256xf32>
    %30 = arith.addf %28, %29 : vector<8x256xf32>
    %cst_18 = arith.constant 0.000000e+00 : f32
    %31 = vector.broadcast %cst_18 : f32 to vector<8x256xf32>
    %32 = arith.maximumf %30, %31 : vector<8x256xf32>
    %33 = arith.truncf %32 : vector<8x256xf32> to vector<8x256xbf16>
    %cst_19 = arith.constant dense<0.000000e+00> : vector<8x128xf32>
    %34 = tpu.matmul %33, %6, %cst_19 {dimension_numbers = #tpu.dot_dimension_numbers<[1], [0], [0], [1], [0, 0, 1, 1], [], []>} : vector<8x256xbf16>, vector<256x128xbf16>, vector<8x128xf32> -> vector<8x128xf32>
    %35 = vector.broadcast %4 : vector<1x128xf32> to vector<8x128xf32>
    %36 = arith.addf %34, %35 : vector<8x128xf32>
    %37 = arith.index_cast %8 : i32 to index
    %c0_20 = arith.constant 0 : index
    %38 = vector.load %arg9[%37, %c0_20] : memref<8x128xf32, #tpu.memory_space<vmem>>, vector<8x128xf32>
    tpu.vector_store %arg9[%37, %c0_20], %36 {strides = array<i32>} : memref<8x128xf32, #tpu.memory_space<vmem>>, vector<8x128xf32>,
    %c1_i32 = arith.constant 1 : i32
    return
  }
  func.func @transform_0(%arg0: i32) -> (i32, i32) {
    %c0_i32 = arith.constant 0 : i32
    %c0_i32_0 = arith.constant 0 : i32
    return %arg0, %c0_i32 : i32, i32
  }
  func.func @transform_1(%arg0: i32) -> (i32, i32) {
    %c0_i32 = arith.constant 0 : i32
    %c0_i32_0 = arith.constant 0 : i32
    %c0_i32_1 = arith.constant 0 : i32
    return %c0_i32, %c0_i32_0 : i32, i32
  }
  func.func @transform_2(%arg0: i32) -> (i32, i32) {
    %c0_i32 = arith.constant 0 : i32
    %c0_i32_0 = arith.constant 0 : i32
    %c0_i32_1 = arith.constant 0 : i32
    return %c0_i32, %c0_i32_0 : i32, i32
  }
  func.func @transform_3(%arg0: i32) -> (i32, i32) {
    %c0_i32 = arith.constant 0 : i32
    %c0_i32_0 = arith.constant 0 : i32
    %c0_i32_1 = arith.constant 0 : i32
    return %c0_i32, %c0_i32_0 : i32, i32
  }
  func.func @transform_4(%arg0: i32) -> (i32, i32) {
    %c0_i32 = arith.constant 0 : i32
    %c0_i32_0 = arith.constant 0 : i32
    %c0_i32_1 = arith.constant 0 : i32
    return %c0_i32, %c0_i32_0 : i32, i32
  }
  func.func @transform_5(%arg0: i32) -> (i32, i32) {
    %c0_i32 = arith.constant 0 : i32
    %c0_i32_0 = arith.constant 0 : i32
    %c0_i32_1 = arith.constant 0 : i32
    return %c0_i32, %c0_i32_0 : i32, i32
  }
  func.func @transform_6(%arg0: i32) -> (i32, i32) {
    %c0_i32 = arith.constant 0 : i32
    %c0_i32_0 = arith.constant 0 : i32
    %c0_i32_1 = arith.constant 0 : i32
    return %c0_i32, %c0_i32_0 : i32, i32
  }
  func.func @transform_7(%arg0: i32) -> (i32, i32) {
    %c0_i32 = arith.constant 0 : i32
    %c0_i32_0 = arith.constant 0 : i32
    %c0_i32_1 = arith.constant 0 : i32
    return %c0_i32, %c0_i32_0 : i32, i32
  }
  func.func @transform_8(%arg0: i32) -> (i32, i32) {
    %c0_i32 = arith.constant 0 : i32
    %c0_i32_0 = arith.constant 0 : i32
    return %arg0, %c0_i32 : i32, i32
  }
}

</mosaic_0001>

<bundles_post_ra>
// kernel: tpu_custom_call.1
= control target key start
LH: loop header
LB: loop body
LE: loop exit
PB: predicated region body
PF: predicated region fallthrough
CT: control target
= control target key end

     0   :  { %13 = vsyncpa [#allocation3], 0  ;;  %s1136_s0 = inlined_call_operand.hbm [shape: f32[8,128], index: 0, kind: input, shape index: {}]   ;;  %s1137_s1 = inlined_call_operand.hbm [shape: f32[128,128], index: 1, kind: input, shape index: {}]   ;;  %s1138_s2 = inlined_call_operand.vmem [shape: f32[1,128], index: 2, kind: input, shape index: {}]   ;;  %s1139_s3 = inlined_call_operand.vmem [shape: f32[1,128], index: 3, kind: input, shape index: {}]   ;;  %s1140_s4 = inlined_call_operand.hbm [shape: bf16[128,256], index: 4, kind: input, shape index: {}]   ;;  %s1141_s5 = inlined_call_operand.vmem [shape: f32[1,256], index: 5, kind: input, shape index: {}]   ;;  %s1142_s6 = inlined_call_operand.hbm [shape: bf16[256,128], index: 6, kind: input, shape index: {}]   ;;  %s1143_s7 = inlined_call_operand.vmem [shape: f32[1,128], index: 7, kind: input, shape index: {}]   ;;  %s1144_s8 = inlined_call_operand.hbm [shape: f32[8,128], index: 8, kind: output, shape index: {}]  }
   0x1   :  { %14 = vsyncpa [#allocation6], 0 }
   0x2   :  { %15 = vsyncpa [#allocation9], 0 }
   0x3   :  { %16 = vsyncpa [#allocation4], 0  ;;  %s994_s27 = smov [#allocation5]   ;;  %s876_s9 = scalar_lea.hbm %s1137_s1, 2048 }
   0x4   :  { %s32_s28 = sshll.u32 %s994_s27, 4  ;;  %p877_p0 = scmp.ne.s32.totalorder %s1137_s1, %s876_s9  ;;  %s33_s28 = int_to_ptr.vmem [resolvable:$true] %s32_s28 }
   0x5   :  { %p880_p1 = scmp.lt.u32.totalorder %s876_s9, %s1137_s1 }
   0x7   :  { %p882_p2 = pnand %p880_p1, %p877_p0 }
   0x9   :  { %885 = shalt.err (!%p882_p2)
}
   0xa   :  { %s886_s14 = scalar_lea.vmem %s33_s28, 2048  ;;  %p891_p4 = scmp.lt.s32.totalorder %s33_s28, %s33_s28 }
   0xb   :  { %p887_p3 = scmp.ne.s32.totalorder %s33_s28, %s886_s14  ;;  %p892_p5 = scmp.lt.s32.totalorder %s886_s14, %s886_s14 }
   0xd   :  { %p893_p6 = por %p892_p5, %p891_p4 }
   0xf   :  { %p894_p7 = pnand %p893_p6, %p887_p3 }
  0x11   :  { %897 = shalt.err (!%p894_p7)
}
  0x12   :  { %s995_s15 = smov 128   ;;  %s996_s16 = smov 8  }
  0x13   :  { %38 = dma.hbm_to_vmem [thread:$0]  %s1137_s1, 2048, %s33_s28, [#allocation6], %s995_s15, %s995_s15, %s996_s16  }
  0x14   :  { %s997_s19 = smov [#allocation2]   ;;  %s998_s21 = smov [#allocation7]  }
  0x15   :  { %s23_s20 = sshll.u32 %s997_s19, 4  ;;  %s48_s22 = sshll.u32 %s998_s21, 4  ;;  %s24_s20 = int_to_ptr.vmem [resolvable:$true] %s23_s20  ;;  %s49_s22 = int_to_ptr.vmem [resolvable:$true] %s48_s22 }
  0x16   :  { %s898_s25 = scalar_lea.hbm %s1136_s0, 128 }
  0x17   :  { %p899_p8 = scmp.ne.s32.totalorder %s1136_s0, %s898_s25  ;;  %p902_p9 = scmp.lt.u32.totalorder %s898_s25, %s1136_s0 }
  0x19   :  { %p904_p10 = pnand %p902_p9, %p899_p8 }
  0x1b   :  { %907 = shalt.err (!%p904_p10)
}
  0x1c   :  { %s908_s1 = scalar_lea.vmem %s24_s20, 128  ;;  %p913_p12 = scmp.lt.s32.totalorder %s24_s20, %s24_s20 }
  0x1d   :  { %p909_p11 = scmp.ne.s32.totalorder %s24_s20, %s908_s1  ;;  %p914_p13 = scmp.lt.s32.totalorder %s908_s1, %s908_s1 }
  0x1f   :  { %p915_p0 = por %p914_p13, %p913_p12 }
  0x21   :  { %p916_p1 = pnand %p915_p0, %p909_p11 }
  0x23   :  { %919 = shalt.err (!%p916_p1)
}
  0x24   :  { %26 = dma.hbm_to_vmem [thread:$0]  %s1136_s0, 128, %s24_s20, [#allocation3]  }
  0x25   :  { %s920_s12 = scalar_lea.hbm %s1140_s4, 2048 }
  0x26   :  { %p921_p2 = scmp.ne.s32.totalorder %s1140_s4, %s920_s12  ;;  %p924_p3 = scmp.lt.u32.totalorder %s920_s12, %s1140_s4 }
  0x28   :  { %p926_p4 = pnand %p924_p3, %p921_p2 }
  0x2a   :  { %929 = shalt.err (!%p926_p4)
}
  0x2b   :  { %s930_s19 = scalar_lea.vmem %s49_s22, 2048  ;;  %p935_p6 = scmp.lt.s32.totalorder %s49_s22, %s49_s22 }
  0x2c   :  { %p931_p5 = scmp.ne.s32.totalorder %s49_s22, %s930_s19  ;;  %p936_p7 = scmp.lt.s32.totalorder %s930_s19, %s930_s19 }
  0x2e   :  { %p937_p8 = por %p936_p7, %p935_p6 }
  0x30   :  { %p938_p9 = pnand %p937_p8, %p931_p5 }
  0x32   :  { %941 = shalt.err (!%p938_p9)
}
  0x33   :  { %54 = dma.hbm_to_vmem [thread:$0]  %s1140_s4, 2048, %s49_s22, [#allocation6], %s995_s15, %s995_s15, %s996_s16  }
  0x34   :  { %s999_s21 = smov [#allocation8]   ;;  %s942_s26 = scalar_lea.hbm %s1142_s6, 2048 }
  0x35   :  { %s62_s23 = sshll.u32 %s999_s21, 4  ;;  %p943_p10 = scmp.ne.s32.totalorder %s1142_s6, %s942_s26  ;;  %s63_s23 = int_to_ptr.vmem [resolvable:$true] %s62_s23 }
  0x36   :  { %p946_p11 = scmp.lt.u32.totalorder %s942_s26, %s1142_s6 }
  0x38   :  { %p948_p12 = pnand %p946_p11, %p943_p10 }
  0x3a   :  { %951 = shalt.err (!%p948_p12)
}
  0x3b   :  { %s952_s28 = scalar_lea.vmem %s63_s23, 2048  ;;  %p957_p0 = scmp.lt.s32.totalorder %s63_s23, %s63_s23 }
  0x3c   :  { %p953_p13 = scmp.ne.s32.totalorder %s63_s23, %s952_s28  ;;  %p958_p1 = scmp.lt.s32.totalorder %s952_s28, %s952_s28 }
  0x3e   :  { %p959_p2 = por %p958_p1, %p957_p0 }
  0x40   :  { %p960_p3 = pnand %p959_p2, %p953_p13 }
  0x42   :  { %963 = shalt.err (!%p960_p3)
}
  0x43   :  { %s1000_s4 = smov 64   ;;  %s1001_s15 = smov 4  }
  0x44   :  { %68 = dma.hbm_to_vmem [thread:$0]  %s1142_s6, 2048, %s63_s23, [#allocation9], %s1000_s4, %s1000_s4, %s1001_s15  }
  0x45   :  { %986 = dma.done.wait [#allocation3], 128  }
  0x46   :  { %987 = vsyncadd [#allocation3], 4294967168 }
  0x47   :  { %988 = dma.done.wait [#allocation6], 4096  }
  0x48   :  { %989 = vsyncadd [#allocation6], 4294963200 }
  0x49   :  { %990 = dma.done.wait [#allocation9], 2048  }
  0x4a   :  { %991 = vsyncadd [#allocation9], 4294965248  ;;  %v1002_v0 = vmov 0.0|0.0   ;;  %vm1003_vm0 = vmmov 0   ;;  %v1004_v1 = vmov 0.0   ;;  %v84_v2 = vld [vmem:[#allocation5] sm:$0xff] }
  0x4b   :  { %773 = vmatprep.subr.bf16.mxu0 %v1002_v0  ;;  %797 = vmatprep.subr.bf16.mxu1 %v1002_v0  ;;  %v85_v3 = vld [vmem:[#allocation5 + $0x8] sm:$0xff]  ;;  %v86_v4 = vld [vmem:[#allocation5 + $0x10] sm:$0xff]  ;;  %v87_v6 = vld [vmem:[#allocation5 + $0x18] sm:$0xff]  ;;  %v1005_v39 = vmov 0  }
  0x4c   :  { %735 = vmatprep.mubr.msk.f32.mxu0 %vm1003_vm0, %v1004_v1  ;;  %770 = vmatprep.mubr.msk.f32.mxu1 %vm1003_vm0, %v1004_v1  ;;  %v774_v5 = vpack.c.bf16 %v85_v3, %v84_v2  ;;  %v777_v7 = vpack.c.bf16 %v87_v6, %v86_v4  ;;  %v88_v8 = vld [vmem:[#allocation5 + $0x20] sm:$0xff]  ;;  %v89_v9 = vld [vmem:[#allocation5 + $0x28] sm:$0xff]  ;;  %v90_v10 = vld [vmem:[#allocation5 + $0x30] sm:$0xff] }
  0x4d   :  { %v91_v11 = vld [vmem:[#allocation5 + $0x38] sm:$0xff]  ;;  %v780_v12 = vpack.c.bf16 %v89_v9, %v88_v8  ;;  %v92_v13 = vld [vmem:[#allocation5 + $0x40] sm:$0xff]  ;;  %v93_v14 = vld [vmem:[#allocation5 + $0x48] sm:$0xff] }
  0x4e   :  { %775 = vmatpush3.bf16.msra.mxu0 %v774_v5  ;;  %799 = vmatpush3.bf16.msra.mxu1 %v774_v5  ;;  %v783_v15 = vpack.c.bf16 %v91_v11, %v90_v10  ;;  %v94_v16 = vld [vmem:[#allocation5 + $0x50] sm:$0xff]  ;;  %v95_v17 = vld [vmem:[#allocation5 + $0x58] sm:$0xff]  ;;  %v786_v18 = vpack.c.bf16 %v93_v14, %v92_v13  ;;  %v96_v19 = vld [vmem:[#allocation5 + $0x60] sm:$0xff]  ;;  %v317_v13 = vlaneseq }
  0x4f   :  { %776 = vmatprep.subr.bf16.mxu0 %v1002_v0  ;;  %800 = vmatprep.subr.bf16.mxu1 %v1002_v0  ;;  %v97_v20 = vld [vmem:[#allocation5 + $0x68] sm:$0xff]  ;;  %v789_v21 = vpack.c.bf16 %v95_v17, %v94_v16  ;;  %v98_v23 = vld [vmem:[#allocation5 + $0x70] sm:$0xff]  ;;  %v99_v24 = vld [vmem:[#allocation5 + $0x78] sm:$0xff] }
  0x50   :  { %v792_v22 = vpack.c.bf16 %v97_v20, %v96_v19  ;;  %v795_v25 = vpack.c.bf16 %v99_v24, %v98_v23  ;;  %v1106_v26 = vld [vmem:[#allocation2] sm:$0xff]  ;;  %v836_v27 = vld [vmem:[#allocation7 + $0x4] ss:$8 sps:$4 sm:$0xff]   ;;  %v834_v29 = vld [vmem:[#allocation7] ss:$8 sps:$4 sm:$0xff]   ;;  %v318_v14 = vshrl.u32 %v317_v13, 7 }
  0x51   :  { %v223_v28 = vmul.f32 %v1106_v26, %v1106_v26  ;;  %v839_v30 = vld [vmem:[#allocation7 + $0x14] ss:$8 sps:$4 sm:$0xff]   ;;  %v837_v31 = vld [vmem:[#allocation7 + $0x10] ss:$8 sps:$4 sm:$0xff]   ;;  %v842_v32 = vld [vmem:[#allocation7 + $0x24] ss:$8 sps:$4 sm:$0xff]  }
  0x52   :  { %778 = vmatpush3.bf16.msra.mxu0 %v777_v7  ;;  %802 = vmatpush3.bf16.msra.mxu1 %v777_v7  ;;  %v840_v33 = vld [vmem:[#allocation7 + $0x20] ss:$8 sps:$4 sm:$0xff]   ;;  %v845_v34 = vld [vmem:[#allocation7 + $0x34] ss:$8 sps:$4 sm:$0xff]   ;;  %v843_v35 = vld [vmem:[#allocation7 + $0x30] ss:$8 sps:$4 sm:$0xff]  }
  0x53   :  { %779 = vmatprep.subr.bf16.mxu0 %v1002_v0  ;;  %803 = vmatprep.subr.bf16.mxu1 %v1002_v0  ;;  %v846_v36 = vld [vmem:[#allocation7 + $0x40] ss:$8 sps:$4 sm:$0xff]   ;;  %v848_v37 = vld [vmem:[#allocation7 + $0x44] ss:$8 sps:$4 sm:$0xff]   ;;  %v851_v38 = vld [vmem:[#allocation7 + $0x54] ss:$8 sps:$4 sm:$0xff]  }
  0x54   :  { %v849_v40 = vld [vmem:[#allocation7 + $0x50] ss:$8 sps:$4 sm:$0xff]   ;;  %v854_v41 = vld [vmem:[#allocation7 + $0x64] ss:$8 sps:$4 sm:$0xff]   ;;  %v852_v42 = vld [vmem:[#allocation7 + $0x60] ss:$8 sps:$4 sm:$0xff]  }
  0x55   :  { %v857_v43 = vld [vmem:[#allocation7 + $0x74] ss:$8 sps:$4 sm:$0xff]   ;;  %v855_v44 = vld [vmem:[#allocation7 + $0x70] ss:$8 sps:$4 sm:$0xff]   ;;  %v858_v45 = vld [vmem:[#allocation8 + $0x40] sm:$0xff]   ;;  %v323_v17 = vsub.s32 1, %v318_v14 }
  0x56   :  { %781 = vmatpush3.bf16.msra.mxu0 %v780_v12  ;;  %805 = vmatpush3.bf16.msra.mxu1 %v780_v12  ;;  %v859_v46 = vld [vmem:[#allocation8] sm:$0xff]   ;;  %v860_v47 = vld [vmem:[#allocation8 + $0x48] sm:$0xff]   ;;  %v862_v49 = vld [vmem:[#allocation8 + $0x50] sm:$0xff]  }
  0x57   :  { %782 = vmatprep.subr.bf16.mxu0 %v1002_v0  ;;  %806 = vmatprep.subr.bf16.mxu1 %v1002_v0  ;;  %v861_v48 = vld [vmem:[#allocation8 + $0x8] sm:$0xff]   ;;  %v863_v50 = vld [vmem:[#allocation8 + $0x10] sm:$0xff]   ;;  %v864_v51 = vld [vmem:[#allocation8 + $0x58] sm:$0xff]  }
  0x58   :  { %v865_v52 = vld [vmem:[#allocation8 + $0x18] sm:$0xff]   ;;  %v866_v53 = vld [vmem:[#allocation8 + $0x60] sm:$0xff]   ;;  %v868_v55 = vld [vmem:[#allocation8 + $0x68] sm:$0xff]  }
  0x59   :  { %v867_v54 = vld [vmem:[#allocation8 + $0x20] sm:$0xff]   ;;  %v869_v56 = vld [vmem:[#allocation8 + $0x28] sm:$0xff]   ;;  %v612_v3 = vld [vmem:[%s1138_s2] ss:$0 sm:$0xff] }
  0x5a   :  { %784 = vmatpush3.bf16.msra.mxu0 %v783_v15  ;;  %808 = vmatpush3.bf16.msra.mxu1 %v783_v15  ;;  %v613_v5 = vld [vmem:[%s1139_s3] ss:$0 sm:$0xff]  ;;  %v870_v9 = vld [vmem:[#allocation8 + $0x70] sm:$0xff]   ;;  %v319_v15 = vsub.s32 0, %v318_v14 }
  0x5b   :  { %785 = vmatprep.subr.bf16.mxu0 %v1002_v0  ;;  %809 = vmatprep.subr.bf16.mxu1 %v1002_v0  ;;  %v871_v10 = vld [vmem:[#allocation8 + $0x30] sm:$0xff]   ;;  %v872_v11 = vld [vmem:[#allocation8 + $0x78] sm:$0xff]  }
  0x5c   :  { %v873_v12 = vld [vmem:[#allocation8 + $0x38] sm:$0xff]  }
  0x5d   :  { %v102_v16 = vld [vmem:[%s1141_s5] sm:$0x3]  ;;  %s1006_s5 = smov [#allocation10]  }
  0x5e   :  { %787 = vmatpush3.bf16.msra.mxu0 %v786_v18  ;;  %811 = vmatpush3.bf16.msra.mxu1 %v786_v18  ;;  %v320_v18 = vrot.slane %v102_v16, %v319_v15  ;;  %v324_v19 = vrot.slane %v102_v16, %v323_v17  ;;  %s601_s14 = sshll.u32 %s1006_s5, 4  ;;  %s602_s14 = int_to_ptr.vmem [resolvable:$true] %s601_s14 }
  0x5f   :  { %788 = vmatprep.subr.bf16.mxu0 %v1002_v0  ;;  %812 = vmatprep.subr.bf16.mxu1 %v1002_v0  ;;  %s964_s17 = scalar_lea.vmem %s602_s14, 128  ;;  %p969_p5 = scmp.lt.s32.totalorder %s602_s14, %s602_s14 }
  0x60   :  { %p965_p4 = scmp.ne.s32.totalorder %s602_s14, %s964_s17  ;;  %p970_p6 = scmp.lt.s32.totalorder %s964_s17, %s964_s17 }
  0x62   :  { %790 = vmatpush3.bf16.msra.mxu0 %v789_v21  ;;  %814 = vmatpush3.bf16.msra.mxu1 %v789_v21  ;;  %p971_p7 = por %p970_p6, %p969_p5 }
  0x63   :  { %791 = vmatprep.subr.bf16.mxu0 %v1002_v0  ;;  %815 = vmatprep.subr.bf16.mxu1 %v1002_v0 }
  0x64   :  { %p972_p8 = pnand %p971_p7, %p965_p4 }
  0x66   :  { %793 = vmatpush3.bf16.msra.mxu0 %v792_v22  ;;  %817 = vmatpush3.bf16.msra.mxu1 %v792_v22 }
  0x67   :  { %794 = vmatprep.subr.bf16.mxu0 %v1002_v0  ;;  %818 = vmatprep.subr.bf16.mxu1 %v1002_v0 }
  0x6a   :  { %796 = vmatpush3.bf16.msra.mxu0 %v795_v25  ;;  %820 = vmatpush3.bf16.msra.mxu1 %v795_v25 }
  0x6b   :  { %407 = vmatprep.subr.bf16.mxu0 %v836_v27  ;;  %681 = vmatprep.subr.bf16.mxu1 %v858_v45 }
  0x6d   :  { %736 = vmatmul.mubr.f32.vlgmr.msra.gmra.mrb[0].mxu0 %v1106_v26  ;;  %771 = vmatmul.mubr.f32.vlgmr.msra.gmra.mrb[0].mxu1 %v223_v28 }
  0x6e   :  { %408 = vmatpush1.bf16.msra.mxu0 %v834_v29  ;;  %439 = vmatprep.mubr.bf16.mxu0 %v1005_v39 }
  0x6f   :  { %409 = vmatprep.subr.bf16.mxu0 %v839_v30  ;;  %682 = vmatpush3.bf16.msra.mxu1 %v859_v46 }
  0x70   :  { %683 = vmatprep.subr.bf16.mxu1 %v860_v47 }
  0x72   :  { %410 = vmatpush1.bf16.msra.mxu0 %v837_v31  ;;  %v630_v31 = vld [vmem:[%s1143_s7] ss:$0 sm:$0xff] }
  0x73   :  { %411 = vmatprep.subr.bf16.mxu0 %v842_v32  ;;  %684 = vmatpush3.bf16.msra.mxu1 %v861_v48 }
  0x74   :  { %685 = vmatprep.subr.bf16.mxu1 %v862_v49 }
  0x76   :  { %412 = vmatpush1.bf16.msra.mxu0 %v840_v33 }
  0x77   :  { %413 = vmatprep.subr.bf16.mxu0 %v845_v34  ;;  %686 = vmatpush3.bf16.msra.mxu1 %v863_v50 }
  0x78   :  { %687 = vmatprep.subr.bf16.mxu1 %v864_v51 }
  0x7a   :  { %414 = vmatpush1.bf16.msra.mxu0 %v843_v35 }
  0x7b   :  { %415 = vmatprep.subr.bf16.mxu0 %v848_v37  ;;  %688 = vmatpush3.bf16.msra.mxu1 %v865_v52 }
  0x7c   :  { %689 = vmatprep.subr.bf16.mxu1 %v866_v53 }
  0x7e   :  { %416 = vmatpush1.bf16.msra.mxu0 %v846_v36 }
  0x7f   :  { %417 = vmatprep.subr.bf16.mxu0 %v851_v38  ;;  %690 = vmatpush3.bf16.msra.mxu1 %v867_v54 }
  0x80   :  { %691 = vmatprep.subr.bf16.mxu1 %v868_v55 }
  0x82   :  { %418 = vmatpush1.bf16.msra.mxu0 %v849_v40 }
  0x83   :  { %419 = vmatprep.subr.bf16.mxu0 %v854_v41  ;;  %692 = vmatpush3.bf16.msra.mxu1 %v869_v56 }
  0x84   :  { %693 = vmatprep.subr.bf16.mxu1 %v870_v9 }
  0x86   :  { %420 = vmatpush1.bf16.msra.mxu0 %v852_v42 }
  0x87   :  { %421 = vmatprep.subr.bf16.mxu0 %v857_v43  ;;  %694 = vmatpush3.bf16.msra.mxu1 %v871_v10 }
  0x88   :  { %695 = vmatprep.subr.bf16.mxu1 %v872_v11 }
  0x8a   :  { %422 = vmatpush1.bf16.msra.mxu0 %v855_v44 }
  0x8b   :  { %696 = vmatpush3.bf16.msra.mxu1 %v873_v12 }
 0x140   :  { %v219_v57 = vpop.f32.mrb[0].mxu0  ;;  %v290_v58 = vpop.f32.mrb[0].mxu1 }
 0x141   :  { %v294_v59 = vmul.f32 %v219_v57, %v219_v57  ;;  %v737_v60 = vpop.f32.mrb[1].mxu0  ;;  %v772_v61 = vpop.f32.mrb[1].mxu1  ;;  %v297_v1 = vsub.f32 %v1106_v26, %v219_v57 }
 0x143   :  { %v295_v62 = vsub.f32 %v290_v58, %v294_v59 }
 0x145   :  { %v296_v63 = vmax.f32 %v295_v62, 0.0 }
 0x147   :  { %v298_v0 = vadd.f32 1e-05, %v296_v63 }
 0x149   :  { %874 = vrsqrt.f32 %v298_v0 }
 0x153   :  { %v875_v2 = vpop.eup %874 }
 0x154   :  { %v300_v4 = vmul.f32 %v875_v2, %v297_v1 }
 0x156   :  { %v307_v6 = vmul.f32 %v612_v3, %v300_v4 }
 0x158   :  { %v314_v7 = vadd.f32 %v613_v5, %v307_v6 }
 0x15a   :  { %v315_v8 = vpack.c.bf16 %v314_v7, %v314_v7 }
 0x15c   :  { %440 = vmatmul.mubr.bf16.vlgmr.msra.gmra.mrb[4].mxu0 %v315_v8 }
 0x22f   :  { %v441_v20 = vpop.f32.mrb[4].mxu0 }
 0x230   :  { %v442_v21 = vadd.f32 %v441_v20, %v320_v18  ;;  %v443_v22 = vpop.f32.mrb[5].mxu0 }
 0x231   :  { %v444_v23 = vadd.f32 %v443_v22, %v324_v19  ;;  %v445_v24 = vpop.f32.mrb[6].mxu0 }
 0x232   :  { %v448_v25 = vmax.f32 %v442_v21, 0.0  ;;  %v446_v26 = vpop.f32.mrb[7].mxu0 }
 0x233   :  { %v449_v27 = vmax.f32 %v444_v23, 0.0 }
 0x234   :  { %v450_v29 = vpack.c.bf16 %v448_v25, %v448_v25 }
 0x235   :  { %v451_v28 = vpack.c.bf16 %v449_v27, %v449_v27 }
 0x237   :  { %586 = vmatprep.mubr.bf16.mxu1 %v451_v28 }
 0x238   :  { %587 = vmatmul.mubr.bf16.vlgmr.msra.gmra.mrb[4].mxu1 %v450_v29 }
 0x30b   :  { %v697_v30 = vpop.f32.mrb[4].mxu1 }
 0x30c   :  { %v698_v32 = vpop.f32.mrb[5].mxu1 }
 0x30d   :  { %v699_v33 = vadd.f32 %v698_v32, %v697_v30  ;;  %v700_v34 = vpop.f32.mrb[6].mxu1 }
 0x30e   :  { %v701_v35 = vpop.f32.mrb[7].mxu1 }
 0x30f   :  { %v589_v36 = vadd.f32 %v699_v33, %v630_v31 }
 0x311   :  { %594 = vst [vmem:[#allocation10] sm:$0xff] %v589_v36 }
 0x312   :  { %975 = shalt.err (!%p972_p8)
}
 0x313   :  { %s976_s7 = scalar_lea.hbm %s1144_s8, 128 }
 0x314   :  { %p977_p9 = scmp.ne.s32.totalorder %s1144_s8, %s976_s7  ;;  %p980_p10 = scmp.lt.u32.totalorder %s976_s7, %s1144_s8 }
 0x316   :  { %p982_p11 = pnand %p980_p10, %p977_p9 }
 0x318   :  { %985 = shalt.err (!%p982_p11)
}
 0x319   :  { %604 = dma.vmem_to_hbm [thread:$0]  %s602_s14, 128, %s1144_s8, [#allocation4]  }
 0x31a   :  { %992 = dma.done.wait [#allocation4], 128  }
 0x31b   :  { %993 = vsyncadd [#allocation4], 4294967168 }
 0x31c   :  { %608 = vsyncpa [#allocation3], 1 }
 0x31d   :  { %609 = vsyncpa [#allocation6], 1 }
 0x31e   :  { %610 = vsyncpa [#allocation9], 1 }
 0x31f   :  { %611 = vsyncpa [#allocation4], 1 }

</bundles_post_ra>
